<compile_context>
chip_gen: v6e
topology: v6e:2x2x1
jax: 0.10.0
libtpu: 0.0.40
codegen_flags: <defaults>
</compile_context>

<pallas_src>
import jax
import jax.numpy as jnp
import numpy as np
from jax.experimental import pallas as pl
from jax.experimental.pallas import tpu as pltpu


# Scoped VMEM budget shared by both kernels: <= ~48 MiB fits v7x's 64 MiB
# physical VMEM and is a 1.5-3x raise over the v5e/v6e scoped defaults.
_VMEM_LIMIT_BYTES = 48 * 1024 * 1024


def _pick_block(n, max_block):
    """Largest tile <= max_block that divides n (or n itself if n is small)."""
    if n <= max_block:
        return n
    for cand in (512, 256, 128, 64, 32, 16, 8):
        if cand <= max_block and n % cand == 0:
            return cand
    # TODO(synk): pad + mask ragged dims instead of one full-size block (VMEM risk).
    return n


# ---------------------------------------------------------------------------
# Kernel 1: row-tiled, contraction-tiled projection  y = x @ W  with the
# (H, D) head split done in-kernel, so the outputs land in HBM already in the
# head-major (B, H, L, D) layout the flash kernel consumes (no wrapper
# transposes).  Supports a fused QKV weight (n_out = 3) or a single weight.
# ---------------------------------------------------------------------------
def _proj_heads_kernel(x_ref, w_ref, *rest):
    # x_ref: (1, blk_l, blk_c) bf16 activation tile
    # w_ref: (blk_c, n_out*E) bf16 weight tile (q-scale already folded in)
    # rest : n_out output refs (1, H, blk_l, D) bf16  +  (blk_l, n_out*E) f32 acc
    out_refs, acc_ref = rest[:-1], rest[-1]
    heads = out_refs[0].shape[1]
    head_dim = out_refs[0].shape[3]
    e_out = heads * head_dim
    ke = pl.program_id(2)

    @pl.when(ke == 0)
    def _init():
        acc_ref[...] = jnp.zeros_like(acc_ref)

    acc_ref[...] += jnp.dot(
        x_ref[0], w_ref[...], preferred_element_type=jnp.float32)

    @pl.when(ke == pl.num_programs(2) - 1)
    def _store():
        acc = acc_ref[...]                                  # (blk_l, n_out*E) f32
        for p, out_ref in enumerate(out_refs):
            for h in range(heads):
                c0 = p * e_out + h * head_dim
                # Head-major store: (blk_l, D) slice per head -> out[0, h].
                out_ref[0, h] = acc[:, c0:c0 + head_dim].astype(out_ref.dtype)


def _project_heads(x, w_stack, *, heads, head_dim, n_out):
    """x: (B, L, E) bf16, w_stack: (E, n_out*E) bf16 ->
    tuple of n_out arrays of shape (B, heads, L, head_dim) bf16."""
    B, L, E = x.shape
    cols = w_stack.shape[1]
    blk_l = _pick_block(L, 256)
    # Contraction tile keeps the double-buffered weight block small on v7x
    # even for E >= 2048 (review: tile the (E, E) weight over e_in).
    blk_c = _pick_block(E, 256)
    grid = (B, L // blk_l, E // blk_c)

    out_shape = [jax.ShapeDtypeStruct((B, heads, L, head_dim), jnp.bfloat16)
                 for _ in range(n_out)]
    out_specs = [pl.BlockSpec((1, heads, blk_l, head_dim),
                              lambda b, li, ke: (b, 0, li, 0))
                 for _ in range(n_out)]

    outs = pl.pallas_call(
        _proj_heads_kernel,
        out_shape=out_shape,
        grid_spec=pltpu.PrefetchScalarGridSpec(
            num_scalar_prefetch=0,
            grid=grid,
            in_specs=[
                pl.BlockSpec((1, blk_l, blk_c), lambda b, li, ke: (b, li, ke)),
                pl.BlockSpec((blk_c, cols), lambda b, li, ke: (ke, 0)),
            ],
            out_specs=out_specs,
            scratch_shapes=[pltpu.VMEM((blk_l, cols), jnp.float32)],
        ),
        compiler_params=pltpu.CompilerParams(
            dimension_semantics=("parallel", "parallel", "arbitrary"),
            vmem_limit_bytes=_VMEM_LIMIT_BYTES),
    )(x, w_stack)
    if not isinstance(outs, (list, tuple)):
        outs = (outs,)
    return tuple(outs)


# ---------------------------------------------------------------------------
# Kernel 2: flash-style attention core + fused output projection.
#   scalar prefetch: flat int32 block-skip table (B*nq*nk,) in SMEM.
#   q/k/v blocks: (1, H, blk, D) bf16 head-major.
#   bias block:   (1, blk_q, blk_k) bf16 additive mask (0 / -1e20).
#   wo block:     (H, D, E) bf16; bo: (1, E) f32.
# ---------------------------------------------------------------------------
def _flash_attn_kernel(active_ref, q_ref, k_ref, v_ref, bias_ref, wo_ref, bo_ref,
                       out_ref, m_sc, l_sc, acc_sc):
    b, qi, ki = pl.program_id(0), pl.program_id(1), pl.program_id(2)
    nq, nk = pl.num_programs(1), pl.num_programs(2)

    @pl.when(ki == 0)
    def _init():
        m_sc[...] = jnp.full_like(m_sc, -jnp.inf)
        l_sc[...] = jnp.zeros_like(l_sc)
        acc_sc[...] = jnp.zeros_like(acc_sc)

    # Skip key blocks whose mask tile is all zero (e.g. ~half the tiles of a
    # causal mask): no MXU / EUP / VPU work for those grid steps.
    is_active = active_ref[(b * nq + qi) * nk + ki] > 0

    @pl.when(is_active)
    def _compute():
        q = q_ref[0]      # (H, blk_q, D) bf16, pre-scaled by 1/sqrt(D)
        k = k_ref[0]      # (H, blk_k, D) bf16
        v = v_ref[0]      # (H, blk_k, D) bf16

        # Head-batched QK^T, contraction on the last axis (no K transpose).
        s = jnp.einsum('hqd,hkd->hqk', q, k,
                       preferred_element_type=jnp.float32)
        s = s + bias_ref[...].astype(jnp.float32)    # additive mask bias

        # Online softmax, all in f32 (v5e has no bf16 VPU/EUP).
        m_prev = m_sc[...]
        m_new = jnp.maximum(m_prev, jnp.max(s, axis=-1, keepdims=True))
        alpha = jnp.exp(m_prev - m_new)
        # TODO(synk): on v6e/v7x compute this exp in bf16 (bf16 EUP, ~2x rate)
        # while keeping m/l/alpha in f32; kept f32 so the kernel stays v5e-safe.
        p = jnp.exp(s - m_new)
        l_sc[...] = alpha * l_sc[...] + jnp.sum(p, axis=-1, keepdims=True)
        acc_sc[...] = alpha * acc_sc[...] + jnp.einsum(
            'hqk,hkd->hqd', p.astype(v.dtype), v,
            preferred_element_type=jnp.float32)
        m_sc[...] = m_new

    @pl.when(ki == nk - 1)
    def _finalize():
        heads, _, head_dim = acc_sc.shape
        # EUP reciprocal instead of a VALU divide.
        o = acc_sc[...] * pl.reciprocal(l_sc[...], approx=True)   # (H, blk_q, D) f32

        if head_dim % 128 == 0:
            # Lane-aligned head concat -> one E-deep, MXU-dense fc_out matmul
            # (review: avoids H depth-D contractions under-filling the MXU).
            o_q = jnp.concatenate([o[h] for h in range(heads)], axis=-1)
            w2d = wo_ref[...].reshape(heads * head_dim, -1)
            out = jnp.dot(o_q.astype(w2d.dtype), w2d,
                          preferred_element_type=jnp.float32) + bo_ref[...]
        else:
            # Unaligned head_dim: per-head depth-D contractions (no relayout).
            out = bo_ref[...]
            for h in range(heads):
                out = out + jnp.dot(o[h].astype(wo_ref.dtype), wo_ref[h],
                                    preferred_element_type=jnp.float32)
        out_ref[0] = out.astype(out_ref.dtype)


def _flash_attention(q_h, k_h, v_h, bias, active, wo_hde, bo_2d, *, blk_q, blk_k):
    B, H, Lq, D = q_h.shape
    Lk = k_h.shape[2]
    E = wo_hde.shape[2]
    grid = (B, Lq // blk_q, Lk // blk_k)

    return pl.pallas_call(
        _flash_attn_kernel,
        out_shape=jax.ShapeDtypeStruct((B, Lq, E), jnp.float32),
        grid_spec=pltpu.PrefetchScalarGridSpec(
            num_scalar_prefetch=1,                  # block-skip table -> SMEM
            grid=grid,
            in_specs=[
                pl.BlockSpec((1, H, blk_q, D), lambda b, qi, ki, *_: (b, 0, qi, 0)),
                pl.BlockSpec((1, H, blk_k, D), lambda b, qi, ki, *_: (b, 0, ki, 0)),
                pl.BlockSpec((1, H, blk_k, D), lambda b, qi, ki, *_: (b, 0, ki, 0)),
                pl.BlockSpec((1, blk_q, blk_k), lambda b, qi, ki, *_: (b, qi, ki)),
                # TODO(synk): for E >= 4096 the double-buffered resident Wo no
                # longer fits v7x's 64 MiB VMEM: single-buffer it
                # (pipeline_mode=pl.Buffered(1)) or un-fuse fc_out.
                pl.BlockSpec((H, D, E), lambda b, qi, ki, *_: (0, 0, 0)),
                pl.BlockSpec((1, E), lambda b, qi, ki, *_: (0, 0)),
            ],
            out_specs=pl.BlockSpec((1, blk_q, E), lambda b, qi, ki, *_: (b, qi, 0)),
            scratch_shapes=[
                pltpu.VMEM((H, blk_q, 1), jnp.float32),   # running max m
                pltpu.VMEM((H, blk_q, 1), jnp.float32),   # running sum l
                pltpu.VMEM((H, blk_q, D), jnp.float32),   # output accumulator
            ],
        ),
        compiler_params=pltpu.CompilerParams(
            dimension_semantics=("parallel", "parallel", "arbitrary"),
            vmem_limit_bytes=_VMEM_LIMIT_BYTES),
    )(active, q_h, k_h, v_h, bias, wo_hde, bo_2d)


# ---------------------------------------------------------------------------
# Wrapper: full SelfAttention forward.
# ---------------------------------------------------------------------------
def self_attention_pallas(value, key, query, mask, wq, wk, wv, wo, bo, *, heads):
    """value/key/query: (B, L, E) f32; mask: None or broadcastable to
    (B, 1, Lq, Lk) (0 = masked).  wq/wk/wv/wo: (E, E) PyTorch Linear layout
    (out_features, in_features); bo: (E,)."""
    B, Lq, E = query.shape
    Lk = key.shape[1]
    Lv = value.shape[1]
    assert E % heads == 0, "embed_size must be divisible by heads"
    assert Lk == Lv, "attention requires key_len == value_len"
    D = E // heads
    bf16 = jnp.bfloat16

    # y = x @ W^T; fold the 1/sqrt(head_dim) softmax scale into Wq (free).
    inv_scale = 1.0 / float(D) ** 0.5
    wq_t = (wq.T * inv_scale).astype(bf16)
    wk_t = wk.T.astype(bf16)
    wv_t = wv.T.astype(bf16)
    wo_hde = wo.T.reshape(heads, D, E).astype(bf16)
    bo_2d = bo.reshape(1, E).astype(jnp.float32)

    # --- Q/K/V projections, emitted directly in head-major (B, H, L, D). ---
    if (query is key) and (key is value):
        # Self-attention: fused QKV -> activations are read from HBM once.
        x = query.astype(bf16)
        w_qkv = jnp.concatenate([wq_t, wk_t, wv_t], axis=1)          # (E, 3E)
        q_h, k_h, v_h = _project_heads(x, w_qkv, heads=heads, head_dim=D, n_out=3)
    else:
        (q_h,) = _project_heads(query.astype(bf16), wq_t, heads=heads, head_dim=D, n_out=1)
        (k_h,) = _project_heads(key.astype(bf16), wk_t, heads=heads, head_dim=D, n_out=1)
        (v_h,) = _project_heads(value.astype(bf16), wv_t, heads=heads, head_dim=D, n_out=1)

    # Sequence blocks capped at 256 (v5e scoped VMEM, m/l lane-padding; also
    # keeps B * (Lq/blk_q) >= 2 for v7x megacore at small batch).
    blk_q = _pick_block(Lq, 256)
    blk_k = _pick_block(Lk, 256)
    nq, nk = Lq // blk_q, Lk // blk_k

    if mask is None:
        bias = jnp.zeros((B, Lq, Lk), dtype=bf16)
        active = jnp.ones((B * nq * nk,), dtype=jnp.int32)
    else:
        # TODO(synk): per-head masks (B, H, Lq, Lk) would need a head axis on the
        # bias input; the usual (B, 1, Lq, Lk) / (B, 1, 1, Lk) masks are handled.
        mask_b = jnp.broadcast_to(mask, (B, 1, Lq, Lk)).reshape(B, Lq, Lk)
        # int mask -> additive bf16 bias (0 / -1e20): half the DMA bytes and an
        # add instead of a select in-kernel.
        # TODO(synk): for causal/structured masks generate this bias in-kernel
        # from broadcasted_iota instead of DMAing an O(B*L^2) tensor.
        bias = jnp.where(mask_b == 0, jnp.float32(-1e20),
                         jnp.float32(0.0)).astype(bf16)
        # Block-skip table: 1 iff the (blk_q, blk_k) tile has any unmasked entry.
        active = jnp.any(
            mask_b.reshape(B, nq, blk_q, nk, blk_k) != 0, axis=(2, 4)
        ).astype(jnp.int32).reshape(-1)

    return _flash_attention(q_h, k_h, v_h, bias, active, wo_hde, bo_2d,
                            blk_q=blk_q, blk_k=blk_k)


# ---------------------------------------------------------------------------
# Plain-JAX (f32) replica of the PyTorch forward, for correctness checking.
# ---------------------------------------------------------------------------
def self_attention_ref(value, key, query, mask, wq, wk, wv, wo, bo, *, heads):
    B, Lq, E = query.shape
    Lk = key.shape[1]
    D = E // heads
    q = (query @ wq.T).reshape(B, Lq, heads, D)
    k = (key @ wk.T).reshape(B, Lk, heads, D)
    v = (value @ wv.T).reshape(B, Lk, heads, D)
    energy = jnp.einsum('bqhd,bkhd->bhqk', q, k)
    if mask is not None:
        energy = jnp.where(mask == 0, jnp.float32(-1e20), energy)
    attn = jax.nn.softmax(energy / jnp.sqrt(jnp.float32(D)), axis=3)
    out = jnp.einsum('bhql,blhd->bqhd', attn, v)
    return out.reshape(B, Lq, heads * D) @ wo.T + bo


if __name__ == "__main__":
    def _make_params(rng, E):
        ks = jax.random.split(rng, 5)
        scale = 1.0 / np.sqrt(E)

        def u(k, shape):
            return jax.random.uniform(k, shape, minval=-scale, maxval=scale,
                                      dtype=jnp.float32)
        return (u(ks[0], (E, E)), u(ks[1], (E, E)), u(ks[2], (E, E)),
                u(ks[3], (E, E)), u(ks[4], (E,)))

    root = jax.random.PRNGKey(0)

    # --- Test 1: small self-attention (fused QKV path), single-tile flash. ---
    B, L, E, HEADS = 2, 8, 32, 4
    k_in, k_par = jax.random.split(root)
    x = jax.random.normal(k_in, (B, L, E), dtype=jnp.float32)
    mask = jnp.broadcast_to(jnp.tril(jnp.ones((L, L), jnp.int32))[None, None],
                            (B, 1, L, L))
    wq, wk, wv, wo, bo = _make_params(k_par, E)

    out = jax.block_until_ready(
        self_attention_pallas(x, x, x, mask, wq, wk, wv, wo, bo, heads=HEADS))
    ref = self_attention_ref(x, x, x, mask, wq, wk, wv, wo, bo, heads=HEADS)
    np.testing.assert_allclose(np.asarray(out), np.asarray(ref),
                               atol=5e-2, rtol=5e-2)

    # --- Test 2: distinct q/k/v (separate projection path) and a multi-block
    # flash grid with causal block skipping (the (qi=0, ki=1) tile is fully
    # masked and is skipped via the scalar-prefetched table). ---
    B2, L2, E2, HEADS2 = 1, 512, 64, 4
    ks2 = jax.random.split(root, 4)
    q2 = jax.random.normal(ks2[0], (B2, L2, E2), dtype=jnp.float32)
    k2 = jax.random.normal(ks2[1], (B2, L2, E2), dtype=jnp.float32)
    v2 = jax.random.normal(ks2[2], (B2, L2, E2), dtype=jnp.float32)
    mask2 = jnp.broadcast_to(jnp.tril(jnp.ones((L2, L2), jnp.int32))[None, None],
                             (B2, 1, L2, L2))
    wq2, wk2, wv2, wo2, bo2 = _make_params(ks2[3], E2)

    out2 = jax.block_until_ready(
        self_attention_pallas(v2, k2, q2, mask2, wq2, wk2, wv2, wo2, bo2,
                              heads=HEADS2))
    ref2 = self_attention_ref(v2, k2, q2, mask2, wq2, wk2, wv2, wo2, bo2,
                              heads=HEADS2)
    np.testing.assert_allclose(np.asarray(out2), np.asarray(ref2),
                               atol=5e-2, rtol=5e-2)

    print("KERNEL_OK")
</pallas_src>

<mosaic_0001>
module attributes {stable_mosaic.version = 11 : i64} {
  func.func @_proj_heads_kernel(%arg0: i32, %arg1: i32, %arg2: i32, %arg3: memref<1x8x32xbf16, #tpu.memory_space<vmem>>, %arg4: memref<32x96xbf16, #tpu.memory_space<vmem>>, %arg5: memref<1x4x8x8xbf16, #tpu.memory_space<vmem>>, %arg6: memref<1x4x8x8xbf16, #tpu.memory_space<vmem>>, %arg7: memref<1x4x8x8xbf16, #tpu.memory_space<vmem>>, %arg8: memref<8x96xf32, #tpu.memory_space<vmem>>) attributes {dimension_semantics = [#tpu.dimension_semantics<parallel>, #tpu.dimension_semantics<parallel>, #tpu.dimension_semantics<arbitrary>], iteration_bounds = array<i64: 2, 1, 1>, scalar_prefetch = 0 : i64, scratch_operands = 1 : i64, tpu.core_type = #tpu.core_type<tc>, window_params = [{transform_indices = @transform_0, window_bounds = array<i64: 1, 8, 32>}, {transform_indices = @transform_1, window_bounds = array<i64: 32, 96>}, {transform_indices = @transform_2, window_bounds = array<i64: 1, 4, 8, 8>}, {transform_indices = @transform_3, window_bounds = array<i64: 1, 4, 8, 8>}, {transform_indices = @transform_4, window_bounds = array<i64: 1, 4, 8, 8>}]} {
    %c0_i32 = arith.constant 0 : i32
    %0 = arith.cmpi eq, %arg2, %c0_i32 : i32
    %1 = arith.extui %0 : i1 to i32
    %c0_i32_0 = arith.constant 0 : i32
    %2 = arith.cmpi ne, %1, %c0_i32_0 : i32
    scf.if %2 {
      %cst_11 = arith.constant 0.000000e+00 : f32
      %13 = vector.broadcast %cst_11 : f32 to vector<8x96xf32>
      %c0_12 = arith.constant 0 : index
      %c0_13 = arith.constant 0 : index
      %14 = vector.load %arg8[%c0_12, %c0_13] : memref<8x96xf32, #tpu.memory_space<vmem>>, vector<8x96xf32>
      tpu.vector_store %arg8[%c0_12, %c0_13], %13 {strides = array<i32>} : memref<8x96xf32, #tpu.memory_space<vmem>>, vector<8x96xf32>,
    } else {
    }
    %c0 = arith.constant 0 : index
    %c0_1 = arith.constant 0 : index
    %3 = vector.load %arg8[%c0, %c0_1] : memref<8x96xf32, #tpu.memory_space<vmem>>, vector<8x96xf32>
    %c0_2 = arith.constant 0 : index
    %c0_3 = arith.constant 0 : index
    %c0_4 = arith.constant 0 : index
    %4 = vector.load %arg3[%c0_2, %c0_3, %c0_4] : memref<1x8x32xbf16, #tpu.memory_space<vmem>>, vector<1x8x32xbf16>
    %5 = vector.shape_cast %4 : vector<1x8x32xbf16> to vector<8x32xbf16>
    %c0_5 = arith.constant 0 : index
    %c0_6 = arith.constant 0 : index
    %6 = vector.load %arg4[%c0_5, %c0_6] : memref<32x96xbf16, #tpu.memory_space<vmem>>, vector<32x96xbf16>
    %cst = arith.constant dense<0.000000e+00> : vector<8x96xf32>
    %7 = tpu.matmul %5, %6, %cst {dimension_numbers = #tpu.dot_dimension_numbers<[1], [0], [0], [1], [0, 0, 1, 1], [], []>} : vector<8x32xbf16>, vector<32x96xbf16>, vector<8x96xf32> -> vector<8x96xf32>
    %8 = arith.addf %3, %7 : vector<8x96xf32>
    %c0_7 = arith.constant 0 : index
    %c0_8 = arith.constant 0 : index
    %9 = vector.load %arg8[%c0_7, %c0_8] : memref<8x96xf32, #tpu.memory_space<vmem>>, vector<8x96xf32>
    tpu.vector_store %arg8[%c0_7, %c0_8], %8 {strides = array<i32>} : memref<8x96xf32, #tpu.memory_space<vmem>>, vector<8x96xf32>,
    %c0_i32_9 = arith.constant 0 : i32
    %10 = arith.cmpi eq, %arg2, %c0_i32_9 : i32
    %11 = arith.extui %10 : i1 to i32
    %c0_i32_10 = arith.constant 0 : i32
    %12 = arith.cmpi ne, %11, %c0_i32_10 : i32
    scf.if %12 {
      %c0_11 = arith.constant 0 : index
      %c0_12 = arith.constant 0 : index
      %13 = vector.load %arg8[%c0_11, %c0_12] : memref<8x96xf32, #tpu.memory_space<vmem>>, vector<8x96xf32>
      %14 = vector.extract_strided_slice %13 {offsets = [0, 0], sizes = [8, 8], strides = [1, 1]} : vector<8x96xf32> to vector<8x8xf32>
      %15 = arith.truncf %14 : vector<8x8xf32> to vector<8x8xbf16>
      %c0_13 = arith.constant 0 : index
      %c0_14 = arith.constant 0 : index
      %c0_15 = arith.constant 0 : index
      %c0_16 = arith.constant 0 : index
      %16 = vector.load %arg5[%c0_13, %c0_14, %c0_15, %c0_16] : memref<1x4x8x8xbf16, #tpu.memory_space<vmem>>, vector<1x1x8x8xbf16>
      %17 = vector.shape_cast %16 : vector<1x1x8x8xbf16> to vector<8x8xbf16>
      %18 = vector.shape_cast %15 : vector<8x8xbf16> to vector<1x1x8x8xbf16>
      tpu.vector_store %arg5[%c0_13, %c0_14, %c0_15, %c0_16], %18 {strides = array<i32>} : memref<1x4x8x8xbf16, #tpu.memory_space<vmem>>, vector<1x1x8x8xbf16>,
      %19 = vector.extract_strided_slice %13 {offsets = [0, 8], sizes = [8, 8], strides = [1, 1]} : vector<8x96xf32> to vector<8x8xf32>
      %20 = arith.truncf %19 : vector<8x8xf32> to vector<8x8xbf16>
      %c0_17 = arith.constant 0 : index
      %c1 = arith.constant 1 : index
      %c0_18 = arith.constant 0 : index
      %c0_19 = arith.constant 0 : index
      %21 = vector.load %arg5[%c0_17, %c1, %c0_18, %c0_19] : memref<1x4x8x8xbf16, #tpu.memory_space<vmem>>, vector<1x1x8x8xbf16>
      %22 = vector.shape_cast %21 : vector<1x1x8x8xbf16> to vector<8x8xbf16>
      %23 = vector.shape_cast %20 : vector<8x8xbf16> to vector<1x1x8x8xbf16>
      tpu.vector_store %arg5[%c0_17, %c1, %c0_18, %c0_19], %23 {strides = array<i32>} : memref<1x4x8x8xbf16, #tpu.memory_space<vmem>>, vector<1x1x8x8xbf16>,
      %24 = vector.extract_strided_slice %13 {offsets = [0, 16], sizes = [8, 8], strides = [1, 1]} : vector<8x96xf32> to vector<8x8xf32>
      %25 = arith.truncf %24 : vector<8x8xf32> to vector<8x8xbf16>
      %c0_20 = arith.constant 0 : index
      %c2 = arith.constant 2 : index
      %c0_21 = arith.constant 0 : index
      %c0_22 = arith.constant 0 : index
      %26 = vector.load %arg5[%c0_20, %c2, %c0_21, %c0_22] : memref<1x4x8x8xbf16, #tpu.memory_space<vmem>>, vector<1x1x8x8xbf16>
      %27 = vector.shape_cast %26 : vector<1x1x8x8xbf16> to vector<8x8xbf16>
      %28 = vector.shape_cast %25 : vector<8x8xbf16> to vector<1x1x8x8xbf16>
      tpu.vector_store %arg5[%c0_20, %c2, %c0_21, %c0_22], %28 {strides = array<i32>} : memref<1x4x8x8xbf16, #tpu.memory_space<vmem>>, vector<1x1x8x8xbf16>,
      %29 = vector.extract_strided_slice %13 {offsets = [0, 24], sizes = [8, 8], strides = [1, 1]} : vector<8x96xf32> to vector<8x8xf32>
      %30 = arith.truncf %29 : vector<8x8xf32> to vector<8x8xbf16>
      %c0_23 = arith.constant 0 : index
      %c3 = arith.constant 3 : index
      %c0_24 = arith.constant 0 : index
      %c0_25 = arith.constant 0 : index
      %31 = vector.load %arg5[%c0_23, %c3, %c0_24, %c0_25] : memref<1x4x8x8xbf16, #tpu.memory_space<vmem>>, vector<1x1x8x8xbf16>
      %32 = vector.shape_cast %31 : vector<1x1x8x8xbf16> to vector<8x8xbf16>
      %33 = vector.shape_cast %30 : vector<8x8xbf16> to vector<1x1x8x8xbf16>
      tpu.vector_store %arg5[%c0_23, %c3, %c0_24, %c0_25], %33 {strides = array<i32>} : memref<1x4x8x8xbf16, #tpu.memory_space<vmem>>, vector<1x1x8x8xbf16>,
      %34 = vector.extract_strided_slice %13 {offsets = [0, 32], sizes = [8, 8], strides = [1, 1]} : vector<8x96xf32> to vector<8x8xf32>
      %35 = arith.truncf %34 : vector<8x8xf32> to vector<8x8xbf16>
      %c0_26 = arith.constant 0 : index
      %c0_27 = arith.constant 0 : index
      %c0_28 = arith.constant 0 : index
      %c0_29 = arith.constant 0 : index
      %36 = vector.load %arg6[%c0_26, %c0_27, %c0_28, %c0_29] : memref<1x4x8x8xbf16, #tpu.memory_space<vmem>>, vector<1x1x8x8xbf16>
      %37 = vector.shape_cast %36 : vector<1x1x8x8xbf16> to vector<8x8xbf16>
      %38 = vector.shape_cast %35 : vector<8x8xbf16> to vector<1x1x8x8xbf16>
      tpu.vector_store %arg6[%c0_26, %c0_27, %c0_28, %c0_29], %38 {strides = array<i32>} : memref<1x4x8x8xbf16, #tpu.memory_space<vmem>>, vector<1x1x8x8xbf16>,
      %39 = vector.extract_strided_slice %13 {offsets = [0, 40], sizes = [8, 8], strides = [1, 1]} : vector<8x96xf32> to vector<8x8xf32>
      %40 = arith.truncf %39 : vector<8x8xf32> to vector<8x8xbf16>
      %c0_30 = arith.constant 0 : index
      %c1_31 = arith.constant 1 : index
      %c0_32 = arith.constant 0 : index
      %c0_33 = arith.constant 0 : index
      %41 = vector.load %arg6[%c0_30, %c1_31, %c0_32, %c0_33] : memref<1x4x8x8xbf16, #tpu.memory_space<vmem>>, vector<1x1x8x8xbf16>
      %42 = vector.shape_cast %41 : vector<1x1x8x8xbf16> to vector<8x8xbf16>
      %43 = vector.shape_cast %40 : vector<8x8xbf16> to vector<1x1x8x8xbf16>
      tpu.vector_store %arg6[%c0_30, %c1_31, %c0_32, %c0_33], %43 {strides = array<i32>} : memref<1x4x8x8xbf16, #tpu.memory_space<vmem>>, vector<1x1x8x8xbf16>,
      %44 = vector.extract_strided_slice %13 {offsets = [0, 48], sizes = [8, 8], strides = [1, 1]} : vector<8x96xf32> to vector<8x8xf32>
      %45 = arith.truncf %44 : vector<8x8xf32> to vector<8x8xbf16>
      %c0_34 = arith.constant 0 : index
      %c2_35 = arith.constant 2 : index
      %c0_36 = arith.constant 0 : index
      %c0_37 = arith.constant 0 : index
      %46 = vector.load %arg6[%c0_34, %c2_35, %c0_36, %c0_37] : memref<1x4x8x8xbf16, #tpu.memory_space<vmem>>, vector<1x1x8x8xbf16>
      %47 = vector.shape_cast %46 : vector<1x1x8x8xbf16> to vector<8x8xbf16>
      %48 = vector.shape_cast %45 : vector<8x8xbf16> to vector<1x1x8x8xbf16>
      tpu.vector_store %arg6[%c0_34, %c2_35, %c0_36, %c0_37], %48 {strides = array<i32>} : memref<1x4x8x8xbf16, #tpu.memory_space<vmem>>, vector<1x1x8x8xbf16>,
      %49 = vector.extract_strided_slice %13 {offsets = [0, 56], sizes = [8, 8], strides = [1, 1]} : vector<8x96xf32> to vector<8x8xf32>
      %50 = arith.truncf %49 : vector<8x8xf32> to vector<8x8xbf16>
      %c0_38 = arith.constant 0 : index
      %c3_39 = arith.constant 3 : index
      %c0_40 = arith.constant 0 : index
      %c0_41 = arith.constant 0 : index
      %51 = vector.load %arg6[%c0_38, %c3_39, %c0_40, %c0_41] : memref<1x4x8x8xbf16, #tpu.memory_space<vmem>>, vector<1x1x8x8xbf16>
      %52 = vector.shape_cast %51 : vector<1x1x8x8xbf16> to vector<8x8xbf16>
      %53 = vector.shape_cast %50 : vector<8x8xbf16> to vector<1x1x8x8xbf16>
      tpu.vector_store %arg6[%c0_38, %c3_39, %c0_40, %c0_41], %53 {strides = array<i32>} : memref<1x4x8x8xbf16, #tpu.memory_space<vmem>>, vector<1x1x8x8xbf16>,
      %54 = vector.extract_strided_slice %13 {offsets = [0, 64], sizes = [8, 8], strides = [1, 1]} : vector<8x96xf32> to vector<8x8xf32>
      %55 = arith.truncf %54 : vector<8x8xf32> to vector<8x8xbf16>
      %c0_42 = arith.constant 0 : index
      %c0_43 = arith.constant 0 : index
      %c0_44 = arith.constant 0 : index
      %c0_45 = arith.constant 0 : index
      %56 = vector.load %arg7[%c0_42, %c0_43, %c0_44, %c0_45] : memref<1x4x8x8xbf16, #tpu.memory_space<vmem>>, vector<1x1x8x8xbf16>
      %57 = vector.shape_cast %56 : vector<1x1x8x8xbf16> to vector<8x8xbf16>
      %58 = vector.shape_cast %55 : vector<8x8xbf16> to vector<1x1x8x8xbf16>
      tpu.vector_store %arg7[%c0_42, %c0_43, %c0_44, %c0_45], %58 {strides = array<i32>} : memref<1x4x8x8xbf16, #tpu.memory_space<vmem>>, vector<1x1x8x8xbf16>,
      %59 = vector.extract_strided_slice %13 {offsets = [0, 72], sizes = [8, 8], strides = [1, 1]} : vector<8x96xf32> to vector<8x8xf32>
      %60 = arith.truncf %59 : vector<8x8xf32> to vector<8x8xbf16>
      %c0_46 = arith.constant 0 : index
      %c1_47 = arith.constant 1 : index
      %c0_48 = arith.constant 0 : index
      %c0_49 = arith.constant 0 : index
      %61 = vector.load %arg7[%c0_46, %c1_47, %c0_48, %c0_49] : memref<1x4x8x8xbf16, #tpu.memory_space<vmem>>, vector<1x1x8x8xbf16>
      %62 = vector.shape_cast %61 : vector<1x1x8x8xbf16> to vector<8x8xbf16>
      %63 = vector.shape_cast %60 : vector<8x8xbf16> to vector<1x1x8x8xbf16>
      tpu.vector_store %arg7[%c0_46, %c1_47, %c0_48, %c0_49], %63 {strides = array<i32>} : memref<1x4x8x8xbf16, #tpu.memory_space<vmem>>, vector<1x1x8x8xbf16>,
      %64 = vector.extract_strided_slice %13 {offsets = [0, 80], sizes = [8, 8], strides = [1, 1]} : vector<8x96xf32> to vector<8x8xf32>
      %65 = arith.truncf %64 : vector<8x8xf32> to vector<8x8xbf16>
      %c0_50 = arith.constant 0 : index
      %c2_51 = arith.constant 2 : index
      %c0_52 = arith.constant 0 : index
      %c0_53 = arith.constant 0 : index
      %66 = vector.load %arg7[%c0_50, %c2_51, %c0_52, %c0_53] : memref<1x4x8x8xbf16, #tpu.memory_space<vmem>>, vector<1x1x8x8xbf16>
      %67 = vector.shape_cast %66 : vector<1x1x8x8xbf16> to vector<8x8xbf16>
      %68 = vector.shape_cast %65 : vector<8x8xbf16> to vector<1x1x8x8xbf16>
      tpu.vector_store %arg7[%c0_50, %c2_51, %c0_52, %c0_53], %68 {strides = array<i32>} : memref<1x4x8x8xbf16, #tpu.memory_space<vmem>>, vector<1x1x8x8xbf16>,
      %69 = vector.extract_strided_slice %13 {offsets = [0, 88], sizes = [8, 8], strides = [1, 1]} : vector<8x96xf32> to vector<8x8xf32>
      %70 = arith.truncf %69 : vector<8x8xf32> to vector<8x8xbf16>
      %c0_54 = arith.constant 0 : index
      %c3_55 = arith.constant 3 : index
      %c0_56 = arith.constant 0 : index
      %c0_57 = arith.constant 0 : index
      %71 = vector.load %arg7[%c0_54, %c3_55, %c0_56, %c0_57] : memref<1x4x8x8xbf16, #tpu.memory_space<vmem>>, vector<1x1x8x8xbf16>
      %72 = vector.shape_cast %71 : vector<1x1x8x8xbf16> to vector<8x8xbf16>
      %73 = vector.shape_cast %70 : vector<8x8xbf16> to vector<1x1x8x8xbf16>
      tpu.vector_store %arg7[%c0_54, %c3_55, %c0_56, %c0_57], %73 {strides = array<i32>} : memref<1x4x8x8xbf16, #tpu.memory_space<vmem>>, vector<1x1x8x8xbf16>,
    } else {
    }
    return
  }
  func.func @transform_0(%arg0: i32, %arg1: i32, %arg2: i32) -> (i32, i32, i32) {
    %c0_i32 = arith.constant 0 : i32
    return %arg0, %arg1, %arg2 : i32, i32, i32
  }
  func.func @transform_1(%arg0: i32, %arg1: i32, %arg2: i32) -> (i32, i32) {
    %c0_i32 = arith.constant 0 : i32
    %c0_i32_0 = arith.constant 0 : i32
    return %arg2, %c0_i32 : i32, i32
  }
  func.func @transform_2(%arg0: i32, %arg1: i32, %arg2: i32) -> (i32, i32, i32, i32) {
    %c0_i32 = arith.constant 0 : i32
    %c0_i32_0 = arith.constant 0 : i32
    %c0_i32_1 = arith.constant 0 : i32
    return %arg0, %c0_i32, %arg1, %c0_i32_0 : i32, i32, i32, i32
  }
  func.func @transform_3(%arg0: i32, %arg1: i32, %arg2: i32) -> (i32, i32, i32, i32) {
    %c0_i32 = arith.constant 0 : i32
    %c0_i32_0 = arith.constant 0 : i32
    %c0_i32_1 = arith.constant 0 : i32
    return %arg0, %c0_i32, %arg1, %c0_i32_0 : i32, i32, i32, i32
  }
  func.func @transform_4(%arg0: i32, %arg1: i32, %arg2: i32) -> (i32, i32, i32, i32) {
    %c0_i32 = arith.constant 0 : i32
    %c0_i32_0 = arith.constant 0 : i32
    %c0_i32_1 = arith.constant 0 : i32
    return %arg0, %c0_i32, %arg1, %c0_i32_0 : i32, i32, i32, i32
  }
}

</mosaic_0001>

<bundles_post_ra>
// kernel: tpu_custom_call.1
= control target key start
LH: loop header
LB: loop body
LE: loop exit
PB: predicated region body
PF: predicated region fallthrough
CT: control target
= control target key end

     0   :  { %s1327_s0 = inlined_call_operand.hbm [shape: bf16[2,8,32], index: 0, kind: input, shape index: {}]   ;;  %s1328_s1 = inlined_call_operand.hbm [shape: bf16[32,96], index: 1, kind: input, shape index: {}]   ;;  %s1329_s2 = inlined_call_operand.hbm [shape: bf16[2,4,8,8], index: 2, kind: output, shape index: {0}]   ;;  %s1330_s3 = inlined_call_operand.hbm [shape: bf16[2,4,8,8], index: 3, kind: output, shape index: {1}]   ;;  %s1331_s4 = inlined_call_operand.hbm [shape: bf16[2,4,8,8], index: 4, kind: output, shape index: {2}]  }
   0x1   :  { %1334 = sst [smem:[#allocation16_spill]] %s1328_s1 }
   0x2   :  { %10 = vsyncpa [#allocation4], 0 }
   0x3   :  { %12 = vsyncpa [#allocation4 + $0x1], 0 }
   0x4   :  { %13 = vsyncpa [#allocation7], 0 }
   0x5   :  { %14 = vsyncpa [#allocation5], 0 }
   0x6   :  { %16 = vsyncpa [#allocation5 + $0x1], 0 }
   0x7   :  { %17 = vsyncpa [#allocation10], 0 }
   0x8   :  { %19 = vsyncpa [#allocation10 + $0x1], 0  ;;  %s1040_s15 = smov 0   ;;  %s1042_s16 = smov 0  }
   0x9   :  { %s1044_s17 = smov 0   ;;  %s1046_s18 = smov 0  }
   0xa   :  { %s1048_s19 = smov 0   ;;  %s1050_s20 = smov 0  }
   0xb LB: > { %s1071_s21 = sadd.s32 4294967295, %s992_s20   ;;  %s1332_s22 = sadd.s32 4294967294, %s992_s20   ;;  %s992_s20 = sphi %s1050_s20, %s25_s20   ;;  %s988_s19 = sphi %s1048_s19, %s1353_s19   ;;  %s984_s18 = sphi %s1046_s18, %s1352_s18   ;;  %s980_s17 = sphi %s1044_s17, %s1351_s17   ;;  %s976_s16 = sphi %s1042_s16, %s1350_s16   ;;  %s972_s15 = sphi %s1040_s15, %s1349_s15  }
   0xc   : > { %p68_p0 = scmp.ne.s32.totalorder %s976_s16, %s972_s15  ;;  %p1333_p1 = scmp.eq.s32.totalorder %s1071_s21, 0 }
   0xd   : > { %p126_p3 = scmp.eq.s32.totalorder %s1332_s22, 1  ;;  %p647_p5 = scmp.ge.s32.totalorder %s992_s20, 1 }
   0xe   : > { %p1082_p4 = por %p1333_p1, %p68_p0  ;;  %p189_p7 = scmp.lt.s32.totalorder %s992_s20, 3 }
   0xf   : > { %p1087_p6 = por %p126_p3, %p68_p0  ;;  %s994_s26 = smov [#allocation6]  }
  0x10   : > { %p1092_p8 = pnand %p647_p5, %p189_p7  ;;  %s204_s27 = sshll.u32 %s994_s26, 4  ;;  %s205_s27 = int_to_ptr.vmem [resolvable:$true] %s204_s27 }
  0x11   : > { %s1336_s24 = scalar_select %p1087_p6, 1, 0 }
  0x12   : > { %p709_p9 = pneg %p1092_p8  ;;  %s44_s29 = sadd.s32 1, %s988_s19 }
  0x13   : > { %s809_s30 = scalar_lea.vmem %s205_s27, 256  ;;  %p817_p5 = scmp.lt.s32.totalorder %s205_s27, %s205_s27 }
  0x14   : > { %p1101_p11 = pnand %p709_p9, %p1333_p1  ;;  %p810_p13 = scmp.ne.s32.totalorder %s205_s27, %s809_s30 }
  0x15   : > { %p818_p7 = scmp.lt.s32.totalorder %s809_s30, %s809_s30 }
  0x16   : > { %p800_p12 = pneg %p1101_p11 }
  0x17   : > { %p819_p2 = por %p818_p7, %p817_p5 }
  0x18   : > { %p812_p0 = pnand %p810_p13, %p800_p12 }
  0x1a   : > { %p813_p3 = pneg %p812_p0 }
  0x1c   : > { %p820_p6 = pnand %p819_p2, %p813_p3 }
  0x1e   : > { %823 = shalt.err (!%p820_p6)
}
  0x1f   : > { %s995_s5 = smov 64   ;;  %s996_s6 = smov 4  }
  0x20   : > { %s1339_s1 = sld [smem:[#allocation16_spill]]  ;;  %p46_p2 = scmp.ge.s32.totalorder %s44_s29, 2 }
  0x21   : > { %s55_s9 = sadd.s32 1, %s980_s17  ;;  %p62_p6 = scmp.ne.s32.totalorder %s980_s17, %s976_s16 }
  0x22   : > { %p63_p9 = scmp.eq.s32.totalorder %s992_s20, 0  ;;  %s1355_s29 = smov (%p46_p2, %s44_s29), 0 }
  0x23   : > { %p1341_p13 = scmp.eq.s32.totalorder %s1071_s21, 1  ;;  %s48_s12 = ssub.s32 %s988_s19, %s1355_s29 }
  0x24   : > { %p1119_p12 = por %p63_p9, %p62_p6  ;;  %p728_p3 = scmp.lt.s32.totalorder %s992_s20, 2 }
  0x25   : > { %p1125_p0 = por %p1341_p13, %p62_p6  ;;  %s218_s13 = sand.u32 1, %s980_s17  }
  0x26   : > { %712 = dma.hbm_to_vmem [thread:$0]  (!%p1101_p11), %s1339_s1, 256, %s205_s27, [#allocation7], %s995_s5, %s995_s5, %s996_s6  }
  0x27   : > { %p53_p11 = scmp.eq.s32.totalorder %s48_s12, 0  ;;  %s650_s14 = sshll.u32 %s218_s13, 2 }
  0x28   : > { %s651_s27 = sshll.u32 %s988_s19, 6  ;;  %s222_s6 = scalar_lea.vmem [#allocation3], %s650_s14 }
  0x29   : > { %s1134_s26 = scalar_select %p53_p11, %s980_s17, %s55_s9  }
  0x2a   : > { %s229_s5 = scalar_lea.hbm %s1327_s0, %s651_s27  ;;  %s231_s7 = sshll.u32 %s222_s6, 4  ;;  %s232_s7 = int_to_ptr.vmem [resolvable:$true] %s231_s7 }
  0x2b   : > { %p1142_p5 = pnand %p728_p3, %p1119_p12  ;;  %s219_s22 = scalar_lea.sflag [#allocation4], %s218_s13 }
  0x2c   : > { %s837_s12 = scalar_lea.vmem %s232_s7, 64  ;;  %s997_s9 = smov [#allocation3]  }
  0x2d   : > { %p826_p7 = pneg %p1142_p5  ;;  %p838_p2 = scmp.ne.s32.totalorder %s232_s7, %s837_s12 }
  0x2e   : > { %s842_s1 = sshll.u32 %s997_s9, 4  ;;  %s843_s1 = int_to_ptr.vmem [resolvable:$false] %s842_s1 }
  0x2f   : > { %p840_p6 = pnand %p838_p2, %p826_p7  ;;  %s844_s27 = scalar_lea.vmem %s843_s1, 128 }
  0x30   : > { %p845_p13 = scmp.lt.s32.totalorder %s232_s7, %s843_s1  ;;  %p846_p11 = scmp.lt.s32.totalorder %s844_s27, %s837_s12 }
  0x31   : > { %p841_p9 = pneg %p840_p6 }
  0x32   : > { %p847_p10 = por %p846_p11, %p845_p13 }
  0x34   : > { %p848_p1 = pnand %p847_p10, %p841_p9 }
  0x36   : > { %851 = shalt.err (!%p848_p1)
}
  0x37   : > { %716 = dma.hbm_to_vmem [thread:$0]  (!%p1142_p5), %s229_s5, 64, %s232_s7, %s219_s22  }
  0x38   : > { %240 = sbr.rel (%p1092_p8) target bundleno = 457 (0x1c9), region = 28  ;;  %s1153_s10 = sand.u32 (!%p1092_p8), 1, %s976_s16  }
  0x39   : > { %s653_s13 = sshll.u32 (!%p1092_p8), %s1153_s10, 2  ;;  %s243_s14 = scalar_lea.sflag (!%p1092_p8), [#allocation4], %s1153_s10 }
  0x3a   : > { %s246_s28 = scalar_lea.vmem (!%p1092_p8), [#allocation3], %s653_s13 }
  0x3d   : > { %955 = dma.done.wait (%p1082_p4), %s243_s14, 64  }
  0x3e   : > { %957 = vsyncadd (%p1082_p4), %s243_s14, 4294967232  ;;  %p1344_p1 = scmp.eq.s32.totalorder %s1071_s21, 0 }
  0x40   : > { %959 = dma.done.wait (%p1344_p1), [#allocation7], 256   ;;  %p1345_p10 = pmov %p1344_p1 }
  0x41   : > { %vm291_vm0 = vcmask 785408   ;;  %v998_v0 = vmov 0.0   ;;  %vm999_vm1 = vmmov 0   ;;  %v796_v1 = vld [vmem:[#allocation6 + $0x8] sm:$0xff]   ;;  %v797_v2 = vld [vmem:[#allocation6] sm:$0xff]   ;;  %vm311_vm2 = vcmask 261120  }
  0x42   : > { %961 = vsyncadd (%p1345_p10), [#allocation7], 4294967040  ;;  %292 = vst.msk [vmem:[#allocation2] sm:$0xff] %vm291_vm0, %v998_v0  ;;  %689 = vmatprep.subr.bf16.mxu0 %v998_v0  ;;  %693 = vmatprep.mubr.msk.bf16.mxu0 %vm999_vm1, %v998_v0  ;;  %v294_v3 = vld [vmem:[%s246_s28] sm:$0xf]  ;;  %s1168_s1 = sshll.u32 %s1153_s10, 4 }
  0x43   : > { %690 = vmatpush3.bf16.msra.mxu0 %v796_v1  ;;  %vm363_vm3 = vcmask 60416   ;;  %s1000_s22 = smov 80   ;;  %s1001_s23 = smov 96  }
  0x44   : > { %691 = vmatprep.subr.bf16.mxu0 %v998_v0  ;;  %s1171_s25 = scalar_lea.vmem [#allocation8], %s1168_s1  ;;  %s1002_s30 = smov 72  }
  0x45   : > { %s1003_s5 = smov 88   ;;  %s1004_s6 = smov 112  }
  0x46   : > { %s1005_s7 = smov 120   ;;  %s1006_s8 = smov 64  }
  0x47   : > { %692 = vmatpush3.bf16.msra.mxu0 %v797_v2  ;;  %s1007_s12 = smov 104   ;;  %s1008_s9 = smov 48  }
  0x48   : > { %s1009_s27 = smov 56   ;;  %s1010_s13 = smov 40  }
  0x49   : > { %v293_v4 = vld [vmem:[#allocation2] sm:$0xff]  ;;  %s277_s14 = scalar_lea.vmem [#allocation9], %s1168_s1 }
  0x4a   : > { %694 = vmatmul.mubr.msk.bf16.vlgmr.msra.gmra.mxu0 %vm311_vm2, %v294_v3  ;;  %s463_s28 = sshll.u32 %s277_s14, 4  ;;  %s1183_s28 = int_to_ptr.vmem [resolvable:$true] %s463_s28 }
 0x10a   : > { %v349_v5 = vpop.f32.mrf.mxu0 }
 0x10b   : > { %v355_v6 = vadd.f32 %v349_v5, %v293_v4 }
 0x10c   : > { %v695_v7 = vpop.f32.mrf.mxu0 }
 0x10d   : > { %357 = vst.msk [vmem:[#allocation2] sm:$0xff] %vm291_vm0, %v355_v6 }
 0x10e   : > { %v352_v8 = vpop.f32.mrf.mxu0 }
 0x110   : > { %v696_v9 = vpop.f32.mrf.mxu0 }
 0x114   : > { %v361_v10 = vld [vmem:[#allocation2] sm:$0xff] }
 0x115   : > { %v362_v11 = vpack.c.bf16 %v361_v10, %v361_v10 }
 0x117   : > { %392 = vrot.lane.b32.xlu1 %v362_v11, %s1000_s22  ;;  %383 = vrot.lane.b32.xlu0 %v362_v11, %s1001_s23  ;;  %364 = vst.msk [vmem:[%s1171_s25] sm:$0xf] %vm363_vm3, %v362_v11  ;;  %s426_s22 = sand.u32 1, %s1071_s21   ;;  %s1179_s23 = sshll.u32 %s984_s18, 8 }
 0x118   : > { %s1193_s18 = scalar_lea.sflag [#allocation10], %s426_s22  ;;  %s852_s21 = scalar_lea.vmem %s1183_s28, 256 }
 0x119   : > { %p853_p4 = scmp.ne.s32.totalorder %s1183_s28, %s852_s21 }
 0x11b   : > { %397 = vrot.lane.b32.xlu1 %v362_v11, %s1002_s30  ;;  %387 = vrot.lane.b32.xlu0 %v362_v11, %s1003_s5  ;;  %p854_p8 = pnand %p853_p4, %p1125_p0 }
 0x11d   : > { %p855_p12 = pneg %p854_p8 }
 0x11f   : > { %373 = vrot.lane.b32.xlu1 %v362_v11, %s1004_s6  ;;  %368 = vrot.lane.b32.xlu0 %v362_v11, %s1005_s7  ;;  %s1189_s6 = scalar_lea.hbm %s1330_s3, %s1179_s23  ;;  %s1011_s7 = smov [#allocation9]  }
 0x123   : > { %402 = vrot.lane.b32.xlu1 %v362_v11, %s1006_s8  ;;  %378 = vrot.lane.b32.xlu0 %v362_v11, %s1007_s12  ;;  %s856_s12 = sshll.u32 %s1011_s7, 4  ;;  %s857_s12 = int_to_ptr.vmem [resolvable:$false] %s856_s12 }
 0x124   : > { %p859_p3 = scmp.lt.s32.totalorder %s1183_s28, %s857_s12 }
 0x127   : > { %411 = vrot.lane.b32.xlu1 %v362_v11, %s1008_s9  ;;  %406 = vrot.lane.b32.xlu0 %v362_v11, %s1009_s27  ;;  %s858_s9 = scalar_lea.vmem %s857_s12, 512 }
 0x128   : > { %p860_p5 = scmp.lt.s32.totalorder %s858_s9, %s852_s21 }
 0x12a   : > { %p861_p7 = por %p860_p5, %p859_p3 }
 0x12b   : > { %416 = vrot.lane.b32.xlu0 %v362_v11, %s1010_s13 }
 0x12c   : > { %p862_p2 = pnand %p861_p7, %p855_p12 }
 0x189   : > { %v393_v12 = vpop.permute.xlu1 %392  ;;  %v384_v13 = vpop.permute.xlu0 %383 }
 0x18a   : > { %666 = vst.msk [vmem:[%s277_s14 + $0x8] sm:$0xf] %vm363_vm3, %v393_v12  ;;  %386 = vst.msk [vmem:[%s277_s14] sm:$0xf] %vm363_vm3, %v384_v13 }
 0x18d   : > { %v398_v14 = vpop.permute.xlu1 %397  ;;  %v388_v15 = vpop.permute.xlu0 %387 }
 0x18e   : > { %667 = vst.msk [vmem:[%s277_s14 + $0xc] sm:$0xf] %vm363_vm3, %v398_v14  ;;  %665 = vst.msk [vmem:[%s277_s14 + $0x4] sm:$0xf] %vm363_vm3, %v388_v15 }
 0x18f   : > { %865 = shalt.err (!%p862_p2)
}
 0x190   : > { %s866_s27 = scalar_lea.hbm %s1189_s6, 256  ;;  %s870_s22 = scalar_lea.hbm %s1330_s3, 512 }
 0x191   : > { %p867_p6 = scmp.ne.s32.totalorder %s1189_s6, %s866_s27  ;;  %p871_p11 = scmp.lt.s32.totalorder %s1189_s6, %s1330_s3 }
 0x192   : > { %p872_p1 = scmp.lt.s32.totalorder %s870_s22, %s866_s27 }
 0x193   : > { %p868_p9 = pnand %p867_p6, %p1125_p0 }
 0x194   : > { %p873_p10 = por %p872_p1, %p871_p11 }
 0x195   : > { %p869_p13 = pneg %p868_p9 }
 0x197   : > { %p874_p4 = pnand %p873_p10, %p869_p13 }
 0x199   : > { %877 = shalt.err (!%p874_p4)
}
 0x19a   : > { %s1012_s21 = smov 4   ;;  %s446_s7 = sshll.u32 %s1171_s25, 4  ;;  %v374_v16 = vpop.permute.xlu1 %373  ;;  %v369_v17 = vpop.permute.xlu0 %368  ;;  %s1224_s7 = int_to_ptr.vmem [resolvable:$true] %s446_s7 }
 0x19b   : > { %704 = dma.vmem_to_hbm [thread:$0]  (%p1125_p0), %s1183_s28, 256, %s1189_s6, %s1193_s18, %s1006_s8, %s1006_s8, %s1012_s21  }
 0x19c   : > { %663 = vst.msk [vmem:[%s1171_s25 + $0x8] sm:$0xf] %vm363_vm3, %v374_v16  ;;  %662 = vst.msk [vmem:[%s1171_s25 + $0x4] sm:$0xf] %vm363_vm3, %v369_v17  ;;  %s1230_s27 = scalar_lea.hbm %s1329_s2, %s1179_s23  ;;  %s1233_s28 = scalar_lea.vmem [#allocation11], %s1168_s1 }
 0x19d   : > { %s422_s6 = scalar_lea.sflag [#allocation5], %s1153_s10  ;;  %s878_s13 = scalar_lea.vmem %s1224_s7, 256 }
 0x19e   : > { %v403_v18 = vpop.permute.xlu1 %402  ;;  %v379_v19 = vpop.permute.xlu0 %378  ;;  %p879_p8 = scmp.ne.s32.totalorder %s1224_s7, %s878_s13  ;;  %s1013_s14 = smov [#allocation8]  }
 0x19f   : > { %405 = vst.msk [vmem:[%s1233_s28] sm:$0xf] %vm363_vm3, %v403_v18  ;;  %664 = vst.msk [vmem:[%s1171_s25 + $0xc] sm:$0xf] %vm363_vm3, %v379_v19  ;;  %s882_s22 = sshll.u32 %s1013_s14, 4  ;;  %s883_s22 = int_to_ptr.vmem [resolvable:$false] %s882_s22 }
 0x1a0   : > { %p880_p12 = pnand %p879_p8, %p1125_p0  ;;  %s884_s30 = scalar_lea.vmem %s883_s22, 512 }
 0x1a1   : > { %p885_p5 = scmp.lt.s32.totalorder %s1224_s7, %s883_s22  ;;  %p886_p7 = scmp.lt.s32.totalorder %s884_s30, %s878_s13 }
 0x1a2   : > { %p881_p3 = pneg %p880_p12 }
 0x1a3   : > { %p887_p2 = por %p886_p7, %p885_p5 }
 0x1a5   : > { %p888_p6 = pnand %p887_p2, %p881_p3 }
 0x1a7   : > { %891 = shalt.err (!%p888_p6)
}
 0x1a8   : > { %s892_s1 = scalar_lea.hbm %s1230_s27, 256  ;;  %s896_s5 = scalar_lea.hbm %s1329_s2, 512 }
 0x1a9   : > { %p893_p9 = scmp.ne.s32.totalorder %s1230_s27, %s892_s1  ;;  %p897_p1 = scmp.lt.s32.totalorder %s1230_s27, %s1329_s2 }
 0x1aa   : > { %p898_p10 = scmp.lt.s32.totalorder %s896_s5, %s892_s1 }
 0x1ab   : > { %p894_p13 = pnand %p893_p9, %p1125_p0 }
 0x1ac   : > { %p899_p4 = por %p898_p10, %p897_p1 }
 0x1ad   : > { %p895_p11 = pneg %p894_p13 }
 0x1af   : > { %p900_p8 = pnand %p899_p4, %p895_p11 }
 0x1b1   : > { %903 = shalt.err (!%p900_p8)
}
 0x1b2   : > { %703 = dma.vmem_to_hbm [thread:$0]  (%p1125_p0), %s1224_s7, 256, %s1230_s27, %s422_s6, %s1006_s8, %s1006_s8, %s1012_s21   ;;  %v412_v20 = vpop.permute.xlu1 %411  ;;  %v407_v21 = vpop.permute.xlu0 %406 }
 0x1b3   : > { %s480_s13 = sshll.u32 %s1233_s28, 4  ;;  %669 = vst.msk [vmem:[%s1233_s28 + $0x8] sm:$0xf] %vm363_vm3, %v412_v20  ;;  %668 = vst.msk [vmem:[%s1233_s28 + $0x4] sm:$0xf] %vm363_vm3, %v407_v21  ;;  %s1274_s30 = scalar_lea.hbm %s1331_s4, %s1179_s23  ;;  %s1268_s13 = int_to_ptr.vmem [resolvable:$true] %s480_s13 }
 0x1b4   : > { %s904_s7 = scalar_lea.vmem %s1268_s13, 256  ;;  %s1014_s27 = smov [#allocation11]  }
 0x1b5   : > { %p905_p12 = scmp.ne.s32.totalorder %s1268_s13, %s904_s7  ;;  %s908_s6 = sshll.u32 %s1014_s27, 4  ;;  %s909_s6 = int_to_ptr.vmem [resolvable:$false] %s908_s6 }
 0x1b6   : > { %v417_v22 = vpop.permute.xlu0 %416  ;;  %s910_s1 = scalar_lea.vmem %s909_s6, 512  ;;  %p911_p7 = scmp.lt.s32.totalorder %s1268_s13, %s909_s6 }
 0x1b7   : > { %670 = vst.msk [vmem:[%s1233_s28 + $0xc] sm:$0xf] %vm363_vm3, %v417_v22  ;;  %p906_p3 = pnand %p905_p12, %p1125_p0  ;;  %p912_p2 = scmp.lt.s32.totalorder %s910_s1, %s904_s7 }
 0x1b9   : > { %p907_p5 = pneg %p906_p3  ;;  %p913_p6 = por %p912_p2, %p911_p7 }
 0x1bb   : > { %p914_p9 = pnand %p913_p6, %p907_p5 }
 0x1bd   : > { %917 = shalt.err (!%p914_p9)
}
 0x1be   : > { %s918_s23 = scalar_lea.hbm %s1274_s30, 256  ;;  %s922_s25 = scalar_lea.hbm %s1331_s4, 512 }
 0x1bf   : > { %p919_p13 = scmp.ne.s32.totalorder %s1274_s30, %s918_s23  ;;  %p923_p10 = scmp.lt.s32.totalorder %s1274_s30, %s1331_s4 }
 0x1c0   : > { %p924_p4 = scmp.lt.s32.totalorder %s922_s25, %s918_s23 }
 0x1c1   : > { %p920_p11 = pnand %p919_p13, %p1125_p0 }
 0x1c2   : > { %p925_p8 = por %p924_p4, %p923_p10 }
 0x1c3   : > { %p921_p1 = pneg %p920_p11 }
 0x1c5   : > { %p926_p12 = pnand %p925_p8, %p921_p1 }
 0x1c7   : > { %929 = shalt.err (!%p926_p12)
}
 0x1c8   : > { %705 = dma.vmem_to_hbm [thread:$0]  (%p1125_p0), %s1268_s13, 256, %s1274_s30, %s1193_s18, %s1006_s8, %s1006_s8, %s1012_s21  }
 0x1c9 PF: > { %s495_s9 = sand.u32 1, %s972_s15   ;;  %p1346_p3 = scmp.ne.s32.totalorder %s1336_s24, 0 }
 0x1ca   : > { %p1347_p5 = scmp.ge.s32.totalorder %s992_s20, 2  ;;  %s496_s14 = scalar_lea.sflag [#allocation5], %s495_s9 }
 0x1cc   : > { %p718_p7 = pnand %p1347_p5, %p1346_p3 }
 0x1ce   : > { %p719_p2 = pneg %p718_p7 }
 0x1d0   : > { %963 = dma.done.wait (%p719_p2), %s496_s14, 256  }
 0x1d1   : > { %965 = vsyncadd (%p719_p2), %s496_s14, 4294967040  ;;  %s1348_s11 = sadd.s32 4294967294, %s992_s20  }
 0x1d2   : > { %s504_s22 = sand.u32 1, %s1348_s11  }
 0x1d3   : > { %s505_s7 = scalar_lea.sflag [#allocation10], %s504_s22 }
 0x1d4   : > { %967 = dma.done.wait (%p719_p2), %s505_s7, 512  }
 0x1d5   : > { %969 = vsyncadd (%p719_p2), %s505_s7, 4294966784  ;;  %s25_s20 = sadd.s32 1, %s992_s20   ;;  %s1349_s15 = smov %s976_s16 }
 0x1d6   : > { %p22_p0 = scmp.ge.s32.totalorder %s25_s20, 4   ;;  %s1350_s16 = smov %s980_s17 }
 0x1d7   : > { %s1351_s17 = smov %s1134_s26  ;;  %s1352_s18 = smov %s988_s19 }
 0x1d8   : > { %s1353_s19 = smov %s1355_s29  ;;  %24 = sbr.rel (!%p22_p0) target bundleno = 11 (0xb), region = 127 }
 0x1dd   :  { %519 = vsyncpa [#allocation4], 1 }
 0x1de   :  { %521 = vsyncpa [#allocation4 + $0x1], 1 }
 0x1df   :  { %522 = vsyncpa [#allocation7], 1 }
 0x1e0   :  { %523 = vsyncpa [#allocation5], 1 }
 0x1e1   :  { %525 = vsyncpa [#allocation5 + $0x1], 1 }
 0x1e2   :  { %526 = vsyncpa [#allocation10], 1 }
 0x1e3   :  { %528 = vsyncpa [#allocation10 + $0x1], 1 }

</bundles_post_ra>
